<compile_context>
chip_gen: v5e
topology: v5e:2x2
jax: 0.10.0
libtpu: 0.0.40
codegen_flags: <defaults>
</compile_context>

<pallas_src>
import jax
import jax.numpy as jnp
from jax.experimental import pallas as pl
from jax.experimental.pallas import tpu as pltpu


def _round_up(x, m):
    return (x + m - 1) // m * m


def layout_encoder_kernel(idx_ref, tab_ref, out_ref):
    """idx_ref: (tile_g, 20) int32 — 4 tokens x [label,x,y,w,h], attribute slab
                offsets pre-added, -1 for masked/padded tokens.
       tab_ref: (4, K1, 4*D) bf16  — block-structured fused (emb@W + b/5) table.
       out_ref: (tile_g, 4*D) f32  — lane-dense output, 4 tokens per row."""
    _, k1, _ = tab_ref.shape
    tg = idx_ref.shape[0]

    # One lane-iota reused for all 4 token slabs (hoisted, not re-broadcast).
    iota = jax.lax.broadcasted_iota(jnp.int32, (tg, k1), 1)

    acc = None
    for t in range(4):
        # Combined one-hot for token slot t over its K1-wide slab.  The 5
        # attribute ranges [j*C,(j+1)*C) are disjoint, so OR-ing the compares
        # is exact; masked tokens (-1) match nothing -> zero slab (incl. bias).
        hit = iota == idx_ref[:, 5 * t : 5 * t + 1]
        for j in range(1, 5):
            hit = jnp.logical_or(hit, iota == idx_ref[:, 5 * t + j : 5 * t + j + 1])
        onehot = hit.astype(jnp.bfloat16)               # single cast per slab
        # Full-N MXU matmul: (tile_g, K1) @ (K1, 4*D=128), f32 accumulate.
        r = jnp.dot(onehot, tab_ref[t], preferred_element_type=jnp.float32)
        acc = r if acc is None else acc + r
    out_ref[...] = acc


def prepare_fused_table(params):
    """Fold fc weight + bias into one bf16 block-structured table.

    Call ONCE per parameter set and reuse across forward calls (hoisted out of
    the per-call path per the perf review)."""
    C, D = params["label_emb"].shape
    fc_w = params["fc_w"]                                      # (5D, D)
    tabs = [params["label_emb"], params["x_emb"], params["y_emb"],
            params["w_emb"], params["h_emb"]]
    base = jnp.concatenate(
        [t @ fc_w[i * D:(i + 1) * D, :] for i, t in enumerate(tabs)], axis=0)
    base = base + params["fc_b"].reshape(1, D) / 5.0           # each token sums 5 rows
    K1 = _round_up(5 * C, 128)                                 # 128-aligned K slab
    base = jnp.pad(base, ((0, K1 - 5 * C), (0, 0)))
    # Block structure: token slot t's table only feeds lanes [t*D, (t+1)*D).
    tab4 = jnp.zeros((4, K1, 4 * D), jnp.float32)
    for t in range(4):
        tab4 = tab4.at[t, :, t * D:(t + 1) * D].set(base)
    return tab4.astype(jnp.bfloat16)


def layout_encoder(label, bbox, mask, fused_tab, num_classes, *, tile_tokens=1024):
    """label: (B,S) int, bbox: (B,S,4) int, mask: (B,S) 0/1 -> (B,S,D) float32."""
    B, S = label.shape
    C = num_classes
    _, K1, D4 = fused_tab.shape
    D = D4 // 4
    N = B * S

    # Per-token indices with attribute slab offsets pre-added; masked tokens -> -1.
    offs = jnp.arange(5, dtype=jnp.int32) * C
    idx = jnp.concatenate(
        [label.reshape(N, 1), bbox.reshape(N, 4)], axis=-1).astype(jnp.int32) + offs
    idx = jnp.where(mask.reshape(N, 1) != 0, idx, -1)

    # Pack 4 tokens per group row -> lane-dense (G, 4*D = 128) output.
    N4 = _round_up(N, 4)
    if N4 != N:
        idx = jnp.pad(idx, ((0, N4 - N), (0, 0)), constant_values=-1)
    G = N4 // 4
    idx_g = idx.reshape(G, 20)

    # Tile sizing + generation-aware VMEM budget (v7x has only 64 MiB physical).
    tile_g = max(8, min(tile_tokens // 4, _round_up(G, 8)))
    try:
        vmem_cap = pltpu.get_tpu_info().vmem_capacity_bytes
    except Exception:
        vmem_cap = 64 * 1024 * 1024
    cap = (vmem_cap * 3) // 4                                   # headroom for internals

    def vmem_estimate(tg):
        io = 2 * tg * (20 * 4 + D4 * 4)          # idx + out blocks, double-buffered
        wt = 2 * 4 * K1 * D4 * 2                 # bf16 fused table, double-buffered
        scratch = 3 * tg * K1 * 4                # iota / compares / one-hot transients
        return 2 * (io + wt + scratch)           # 2x safety factor

    while vmem_estimate(tile_g) > cap and tile_g > 8:
        tile_g //= 2
    tile_g = max(8, (tile_g // 8) * 8)

    G_pad = _round_up(G, tile_g)
    if G_pad != G:
        idx_g = jnp.pad(idx_g, ((0, G_pad - G), (0, 0)), constant_values=-1)

    vmem_budget = int(min(cap, max(4 * 1024 * 1024, vmem_estimate(tile_g))))

    out = pl.pallas_call(
        layout_encoder_kernel,
        out_shape=jax.ShapeDtypeStruct((G_pad, D4), jnp.float32),
        grid=(G_pad // tile_g,),
        in_specs=[
            pl.BlockSpec((tile_g, 20), lambda i: (i, 0)),       # packed indices
            pl.BlockSpec((4, K1, D4), lambda i: (0, 0, 0)),     # fused bf16 table
        ],
        out_specs=pl.BlockSpec((tile_g, D4), lambda i: (i, 0)),
        compiler_params=pltpu.CompilerParams(
            dimension_semantics=("parallel",),                  # shards across TCs on v7x
            vmem_limit_bytes=vmem_budget),
    )(idx_g, fused_tab)

    # (G_pad, 4*D) -> (4*G_pad, D): row 4g+t is lanes [t*D,(t+1)*D) of group g.
    return out.reshape(G_pad * 4, D)[:N].reshape(B, S, D)


def make_params(key, num_classes, output_dim):
    ks = jax.random.split(key, 7)
    emb = lambda k: jax.random.normal(k, (num_classes, output_dim), jnp.float32)
    bound = 1.0 / jnp.sqrt(5.0 * output_dim)
    return {
        "label_emb": emb(ks[0]),
        "x_emb": emb(ks[1]),
        "y_emb": emb(ks[2]),
        "w_emb": emb(ks[3]),
        "h_emb": emb(ks[4]),
        # torch Linear(out,in) stored transposed as (in, out) = (5D, D)
        "fc_w": jax.random.uniform(ks[5], (5 * output_dim, output_dim),
                                   jnp.float32, -bound, bound),
        "fc_b": jax.random.uniform(ks[6], (1, output_dim),
                                   jnp.float32, -bound, bound),
    }


def reference(label, bbox, mask, params):
    h_label = params["label_emb"][label]                      # (B,S,D)
    embs = [params[f"{k}_emb"][bbox[..., i]]
            for i, k in enumerate(["x", "y", "w", "h"])]      # 4 x (B,S,D)
    h_bbox = jnp.concatenate(embs, axis=-1)                   # (B,S,4D)
    h = jnp.concatenate([h_label, h_bbox], axis=-1)           # (B,S,5D)
    h = h @ params["fc_w"] + params["fc_b"][0]
    return h * mask[..., None].astype(jnp.float32)


if __name__ == "__main__":
    B, S, D, C = 2, 8, 32, 16   # batch, seq, output_dim, num_classes(=num_bin_bboxes)
    key = jax.random.PRNGKey(0)
    k_p, k_l, k_b, k_m = jax.random.split(key, 4)

    params = make_params(k_p, C, D)
    label = jax.random.randint(k_l, (B, S), 0, C, jnp.int32)
    bbox = jax.random.randint(k_b, (B, S, 4), 0, C, jnp.int32)
    mask = (jax.random.uniform(k_m, (B, S)) > 0.3).astype(jnp.int32)

    # Fused table is built once per parameter set and reused.
    fused_tab = prepare_fused_table(params)
    jax.block_until_ready(fused_tab)

    out = layout_encoder(label, bbox, mask, fused_tab, num_classes=C)
    jax.block_until_ready(out)

    ref = reference(label, bbox, mask, params)
    assert out.shape == (B, S, D)
    # fc fold is reassociated and the fused table is bf16 -> loosened tolerance
    assert jnp.allclose(out, ref, atol=2e-2, rtol=2e-2)

    print("KERNEL_OK")
</pallas_src>

<mosaic_0001>
module attributes {stable_mosaic.version = 11 : i64} {
  func.func @layout_encoder_kernel(%arg0: i32, %arg1: memref<8x20xi32, #tpu.memory_space<vmem>>, %arg2: memref<4x128x128xbf16, #tpu.memory_space<vmem>>, %arg3: memref<8x128xf32, #tpu.memory_space<vmem>>) attributes {dimension_semantics = [#tpu.dimension_semantics<parallel>], iteration_bounds = array<i64: 1>, scalar_prefetch = 0 : i64, scratch_operands = 0 : i64, tpu.core_type = #tpu.core_type<tc>, window_params = [{transform_indices = @transform_0, window_bounds = array<i64: 8, 20>}, {pipeline_mode = #tpu.pipeline_mode<synchronous>, transform_indices = @transform_1, window_bounds = array<i64: 4, 128, 128>}, {transform_indices = @transform_2, window_bounds = array<i64: 8, 128>}]} {
    %0 = tpu.iota {dimensions = array<i32: 1>} : vector<8x128xi32>
    %c0 = arith.constant 0 : index
    %c0_0 = arith.constant 0 : index
    %1 = vector.load %arg1[%c0, %c0_0] : memref<8x20xi32, #tpu.memory_space<vmem>>, vector<8x1xi32>
    %2 = vector.broadcast %1 : vector<8x1xi32> to vector<8x128xi32>
    %3 = arith.cmpi eq, %0, %2 : vector<8x128xi32>
    %c0_1 = arith.constant 0 : index
    %c1 = arith.constant 1 : index
    %4 = vector.load %arg1[%c0_1, %c1] : memref<8x20xi32, #tpu.memory_space<vmem>>, vector<8x1xi32>
    %5 = vector.broadcast %4 : vector<8x1xi32> to vector<8x128xi32>
    %6 = arith.cmpi eq, %0, %5 : vector<8x128xi32>
    %7 = arith.ori %3, %6 : vector<8x128xi1>
    %c0_2 = arith.constant 0 : index
    %c2 = arith.constant 2 : index
    %8 = vector.load %arg1[%c0_2, %c2] : memref<8x20xi32, #tpu.memory_space<vmem>>, vector<8x1xi32>
    %9 = vector.broadcast %8 : vector<8x1xi32> to vector<8x128xi32>
    %10 = arith.cmpi eq, %0, %9 : vector<8x128xi32>
    %11 = arith.ori %7, %10 : vector<8x128xi1>
    %c0_3 = arith.constant 0 : index
    %c3 = arith.constant 3 : index
    %12 = vector.load %arg1[%c0_3, %c3] : memref<8x20xi32, #tpu.memory_space<vmem>>, vector<8x1xi32>
    %13 = vector.broadcast %12 : vector<8x1xi32> to vector<8x128xi32>
    %14 = arith.cmpi eq, %0, %13 : vector<8x128xi32>
    %15 = arith.ori %11, %14 : vector<8x128xi1>
    %c0_4 = arith.constant 0 : index
    %c4 = arith.constant 4 : index
    %16 = vector.load %arg1[%c0_4, %c4] : memref<8x20xi32, #tpu.memory_space<vmem>>, vector<8x1xi32>
    %17 = vector.broadcast %16 : vector<8x1xi32> to vector<8x128xi32>
    %18 = arith.cmpi eq, %0, %17 : vector<8x128xi32>
    %19 = arith.ori %15, %18 : vector<8x128xi1>
    %20 = arith.extui %19 : vector<8x128xi1> to vector<8x128xi32>
    %21 = arith.sitofp %20 : vector<8x128xi32> to vector<8x128xf32>
    %22 = arith.truncf %21 : vector<8x128xf32> to vector<8x128xbf16>
    %c0_5 = arith.constant 0 : index
    %c0_6 = arith.constant 0 : index
    %c0_7 = arith.constant 0 : index
    %23 = vector.load %arg2[%c0_5, %c0_6, %c0_7] : memref<4x128x128xbf16, #tpu.memory_space<vmem>>, vector<1x128x128xbf16>
    %24 = vector.shape_cast %23 : vector<1x128x128xbf16> to vector<128x128xbf16>
    %cst = arith.constant dense<0.000000e+00> : vector<8x128xf32>
    %25 = tpu.matmul %22, %24, %cst {dimension_numbers = #tpu.dot_dimension_numbers<[1], [0], [0], [1], [0, 0, 1, 1], [], []>} : vector<8x128xbf16>, vector<128x128xbf16>, vector<8x128xf32> -> vector<8x128xf32>
    %c0_8 = arith.constant 0 : index
    %c5 = arith.constant 5 : index
    %26 = vector.load %arg1[%c0_8, %c5] : memref<8x20xi32, #tpu.memory_space<vmem>>, vector<8x1xi32>
    %27 = vector.broadcast %26 : vector<8x1xi32> to vector<8x128xi32>
    %28 = arith.cmpi eq, %0, %27 : vector<8x128xi32>
    %c0_9 = arith.constant 0 : index
    %c6 = arith.constant 6 : index
    %29 = vector.load %arg1[%c0_9, %c6] : memref<8x20xi32, #tpu.memory_space<vmem>>, vector<8x1xi32>
    %30 = vector.broadcast %29 : vector<8x1xi32> to vector<8x128xi32>
    %31 = arith.cmpi eq, %0, %30 : vector<8x128xi32>
    %32 = arith.ori %28, %31 : vector<8x128xi1>
    %c0_10 = arith.constant 0 : index
    %c7 = arith.constant 7 : index
    %33 = vector.load %arg1[%c0_10, %c7] : memref<8x20xi32, #tpu.memory_space<vmem>>, vector<8x1xi32>
    %34 = vector.broadcast %33 : vector<8x1xi32> to vector<8x128xi32>
    %35 = arith.cmpi eq, %0, %34 : vector<8x128xi32>
    %36 = arith.ori %32, %35 : vector<8x128xi1>
    %c0_11 = arith.constant 0 : index
    %c8 = arith.constant 8 : index
    %37 = vector.load %arg1[%c0_11, %c8] : memref<8x20xi32, #tpu.memory_space<vmem>>, vector<8x1xi32>
    %38 = vector.broadcast %37 : vector<8x1xi32> to vector<8x128xi32>
    %39 = arith.cmpi eq, %0, %38 : vector<8x128xi32>
    %40 = arith.ori %36, %39 : vector<8x128xi1>
    %c0_12 = arith.constant 0 : index
    %c9 = arith.constant 9 : index
    %41 = vector.load %arg1[%c0_12, %c9] : memref<8x20xi32, #tpu.memory_space<vmem>>, vector<8x1xi32>
    %42 = vector.broadcast %41 : vector<8x1xi32> to vector<8x128xi32>
    %43 = arith.cmpi eq, %0, %42 : vector<8x128xi32>
    %44 = arith.ori %40, %43 : vector<8x128xi1>
    %45 = arith.extui %44 : vector<8x128xi1> to vector<8x128xi32>
    %46 = arith.sitofp %45 : vector<8x128xi32> to vector<8x128xf32>
    %47 = arith.truncf %46 : vector<8x128xf32> to vector<8x128xbf16>
    %c1_13 = arith.constant 1 : index
    %c0_14 = arith.constant 0 : index
    %c0_15 = arith.constant 0 : index
    %48 = vector.load %arg2[%c1_13, %c0_14, %c0_15] : memref<4x128x128xbf16, #tpu.memory_space<vmem>>, vector<1x128x128xbf16>
    %49 = vector.shape_cast %48 : vector<1x128x128xbf16> to vector<128x128xbf16>
    %cst_16 = arith.constant dense<0.000000e+00> : vector<8x128xf32>
    %50 = tpu.matmul %47, %49, %cst_16 {dimension_numbers = #tpu.dot_dimension_numbers<[1], [0], [0], [1], [0, 0, 1, 1], [], []>} : vector<8x128xbf16>, vector<128x128xbf16>, vector<8x128xf32> -> vector<8x128xf32>
    %51 = arith.addf %25, %50 : vector<8x128xf32>
    %c0_17 = arith.constant 0 : index
    %c10 = arith.constant 10 : index
    %52 = vector.load %arg1[%c0_17, %c10] : memref<8x20xi32, #tpu.memory_space<vmem>>, vector<8x1xi32>
    %53 = vector.broadcast %52 : vector<8x1xi32> to vector<8x128xi32>
    %54 = arith.cmpi eq, %0, %53 : vector<8x128xi32>
    %c0_18 = arith.constant 0 : index
    %c11 = arith.constant 11 : index
    %55 = vector.load %arg1[%c0_18, %c11] : memref<8x20xi32, #tpu.memory_space<vmem>>, vector<8x1xi32>
    %56 = vector.broadcast %55 : vector<8x1xi32> to vector<8x128xi32>
    %57 = arith.cmpi eq, %0, %56 : vector<8x128xi32>
    %58 = arith.ori %54, %57 : vector<8x128xi1>
    %c0_19 = arith.constant 0 : index
    %c12 = arith.constant 12 : index
    %59 = vector.load %arg1[%c0_19, %c12] : memref<8x20xi32, #tpu.memory_space<vmem>>, vector<8x1xi32>
    %60 = vector.broadcast %59 : vector<8x1xi32> to vector<8x128xi32>
    %61 = arith.cmpi eq, %0, %60 : vector<8x128xi32>
    %62 = arith.ori %58, %61 : vector<8x128xi1>
    %c0_20 = arith.constant 0 : index
    %c13 = arith.constant 13 : index
    %63 = vector.load %arg1[%c0_20, %c13] : memref<8x20xi32, #tpu.memory_space<vmem>>, vector<8x1xi32>
    %64 = vector.broadcast %63 : vector<8x1xi32> to vector<8x128xi32>
    %65 = arith.cmpi eq, %0, %64 : vector<8x128xi32>
    %66 = arith.ori %62, %65 : vector<8x128xi1>
    %c0_21 = arith.constant 0 : index
    %c14 = arith.constant 14 : index
    %67 = vector.load %arg1[%c0_21, %c14] : memref<8x20xi32, #tpu.memory_space<vmem>>, vector<8x1xi32>
    %68 = vector.broadcast %67 : vector<8x1xi32> to vector<8x128xi32>
    %69 = arith.cmpi eq, %0, %68 : vector<8x128xi32>
    %70 = arith.ori %66, %69 : vector<8x128xi1>
    %71 = arith.extui %70 : vector<8x128xi1> to vector<8x128xi32>
    %72 = arith.sitofp %71 : vector<8x128xi32> to vector<8x128xf32>
    %73 = arith.truncf %72 : vector<8x128xf32> to vector<8x128xbf16>
    %c2_22 = arith.constant 2 : index
    %c0_23 = arith.constant 0 : index
    %c0_24 = arith.constant 0 : index
    %74 = vector.load %arg2[%c2_22, %c0_23, %c0_24] : memref<4x128x128xbf16, #tpu.memory_space<vmem>>, vector<1x128x128xbf16>
    %75 = vector.shape_cast %74 : vector<1x128x128xbf16> to vector<128x128xbf16>
    %cst_25 = arith.constant dense<0.000000e+00> : vector<8x128xf32>
    %76 = tpu.matmul %73, %75, %cst_25 {dimension_numbers = #tpu.dot_dimension_numbers<[1], [0], [0], [1], [0, 0, 1, 1], [], []>} : vector<8x128xbf16>, vector<128x128xbf16>, vector<8x128xf32> -> vector<8x128xf32>
    %77 = arith.addf %51, %76 : vector<8x128xf32>
    %c0_26 = arith.constant 0 : index
    %c15 = arith.constant 15 : index
    %78 = vector.load %arg1[%c0_26, %c15] : memref<8x20xi32, #tpu.memory_space<vmem>>, vector<8x1xi32>
    %79 = vector.broadcast %78 : vector<8x1xi32> to vector<8x128xi32>
    %80 = arith.cmpi eq, %0, %79 : vector<8x128xi32>
    %c0_27 = arith.constant 0 : index
    %c16 = arith.constant 16 : index
    %81 = vector.load %arg1[%c0_27, %c16] : memref<8x20xi32, #tpu.memory_space<vmem>>, vector<8x1xi32>
    %82 = vector.broadcast %81 : vector<8x1xi32> to vector<8x128xi32>
    %83 = arith.cmpi eq, %0, %82 : vector<8x128xi32>
    %84 = arith.ori %80, %83 : vector<8x128xi1>
    %c0_28 = arith.constant 0 : index
    %c17 = arith.constant 17 : index
    %85 = vector.load %arg1[%c0_28, %c17] : memref<8x20xi32, #tpu.memory_space<vmem>>, vector<8x1xi32>
    %86 = vector.broadcast %85 : vector<8x1xi32> to vector<8x128xi32>
    %87 = arith.cmpi eq, %0, %86 : vector<8x128xi32>
    %88 = arith.ori %84, %87 : vector<8x128xi1>
    %c0_29 = arith.constant 0 : index
    %c18 = arith.constant 18 : index
    %89 = vector.load %arg1[%c0_29, %c18] : memref<8x20xi32, #tpu.memory_space<vmem>>, vector<8x1xi32>
    %90 = vector.broadcast %89 : vector<8x1xi32> to vector<8x128xi32>
    %91 = arith.cmpi eq, %0, %90 : vector<8x128xi32>
    %92 = arith.ori %88, %91 : vector<8x128xi1>
    %c0_30 = arith.constant 0 : index
    %c19 = arith.constant 19 : index
    %93 = vector.load %arg1[%c0_30, %c19] : memref<8x20xi32, #tpu.memory_space<vmem>>, vector<8x1xi32>
    %94 = vector.broadcast %93 : vector<8x1xi32> to vector<8x128xi32>
    %95 = arith.cmpi eq, %0, %94 : vector<8x128xi32>
    %96 = arith.ori %92, %95 : vector<8x128xi1>
    %97 = arith.extui %96 : vector<8x128xi1> to vector<8x128xi32>
    %98 = arith.sitofp %97 : vector<8x128xi32> to vector<8x128xf32>
    %99 = arith.truncf %98 : vector<8x128xf32> to vector<8x128xbf16>
    %c3_31 = arith.constant 3 : index
    %c0_32 = arith.constant 0 : index
    %c0_33 = arith.constant 0 : index
    %100 = vector.load %arg2[%c3_31, %c0_32, %c0_33] : memref<4x128x128xbf16, #tpu.memory_space<vmem>>, vector<1x128x128xbf16>
    %101 = vector.shape_cast %100 : vector<1x128x128xbf16> to vector<128x128xbf16>
    %cst_34 = arith.constant dense<0.000000e+00> : vector<8x128xf32>
    %102 = tpu.matmul %99, %101, %cst_34 {dimension_numbers = #tpu.dot_dimension_numbers<[1], [0], [0], [1], [0, 0, 1, 1], [], []>} : vector<8x128xbf16>, vector<128x128xbf16>, vector<8x128xf32> -> vector<8x128xf32>
    %103 = arith.addf %77, %102 : vector<8x128xf32>
    %c0_35 = arith.constant 0 : index
    %c0_36 = arith.constant 0 : index
    %104 = vector.load %arg3[%c0_35, %c0_36] : memref<8x128xf32, #tpu.memory_space<vmem>>, vector<8x128xf32>
    tpu.vector_store %arg3[%c0_35, %c0_36], %103 {strides = array<i32>} : memref<8x128xf32, #tpu.memory_space<vmem>>, vector<8x128xf32>,
    return
  }
  func.func @transform_0(%arg0: i32) -> (i32, i32) {
    %c0_i32 = arith.constant 0 : i32
    %c0_i32_0 = arith.constant 0 : i32
    return %arg0, %c0_i32 : i32, i32
  }
  func.func @transform_1(%arg0: i32) -> (i32, i32, i32) {
    %c0_i32 = arith.constant 0 : i32
    %c0_i32_0 = arith.constant 0 : i32
    %c0_i32_1 = arith.constant 0 : i32
    %c0_i32_2 = arith.constant 0 : i32
    return %c0_i32, %c0_i32_0, %c0_i32_1 : i32, i32, i32
  }
  func.func @transform_2(%arg0: i32) -> (i32, i32) {
    %c0_i32 = arith.constant 0 : i32
    %c0_i32_0 = arith.constant 0 : i32
    return %arg0, %c0_i32 : i32, i32
  }
}

</mosaic_0001>

<bundles_post_ra>
// kernel: tpu_custom_call.1
= control target key start
LH: loop header
LB: loop body
LE: loop exit
PB: predicated region body
PF: predicated region fallthrough
CT: control target
= control target key end

     0   :  { %7 = vsyncpa [#allocation3], 0  ;;  %s846_s0 = inlined_call_operand.hbm [shape: s32[8,20], index: 0, kind: input, shape index: {}]   ;;  %s847_s1 = inlined_call_operand.hbm [shape: bf16[4,128,128], index: 1, kind: input, shape index: {}]   ;;  %s848_s2 = inlined_call_operand.hbm [shape: f32[8,128], index: 2, kind: output, shape index: {}]  }
   0x1   :  { %8 = vsyncpa [#allocation6], 0 }
   0x2   :  { %9 = vsyncpa [#allocation4], 0  ;;  %s15_s11 = sshll.u32 %s846_s0, 4  ;;  %s774_s12 = smov [#allocation2]   ;;  %s16_s11 = int_to_ptr.hbm [resolvable:$true] %s15_s11 }
   0x3   :  { %s17_s13 = sshll.u32 %s774_s12, 4  ;;  %s25_s16 = sshll.u32 %s847_s1, 4  ;;  %s18_s13 = int_to_ptr.vmem [resolvable:$true] %s17_s13  ;;  %s26_s16 = int_to_ptr.hbm [resolvable:$true] %s25_s16 }
   0x4   :  { %20 = dma.hbm_to_vmem [thread:$0]  %s16_s11, 128, %s18_s13, [#allocation3]  }
   0x5   :  { %s775_s17 = smov [#allocation5]   ;;  %s776_s19 = smov 64  }
   0x6   :  { %s27_s18 = sshll.u32 %s775_s17, 4  ;;  %s777_s20 = smov 4   ;;  %s28_s18 = int_to_ptr.vmem [resolvable:$true] %s27_s18 }
   0x7   :  { %33 = dma.hbm_to_vmem [thread:$0]  %s26_s16, 4096, %s28_s18, [#allocation6], %s776_s19, %s776_s19, %s777_s20  }
   0x8   :  { %768 = dma.done.wait [#allocation3], 128  }
   0x9   :  { %769 = vsyncadd [#allocation3], 4294967168 }
   0xa   :  { %770 = dma.done.wait [#allocation6], 4096  }
   0xb   :  { %771 = vsyncadd [#allocation6], 4294963200  ;;  %v778_v0 = vmov 15   ;;  %v779_v1 = vmov 10   ;;  %v780_v2 = vmov 12   ;;  %v44_v3 = vld [vmem:[#allocation2] sm:$0xff]  ;;  %v42_v44 = vlaneseq }
   0xc   :  { %677 = vset.pattern.permute.xlu1 %v778_v0  ;;  %675 = vset.pattern.permute.xlu0 %v779_v1  ;;  %v781_v4 = vmov 16   ;;  %v782_v5 = vmov 11   ;;  %v783_v6 = vmov 17   ;;  %v784_v7 = vmov 13   ;;  %v640_v13 = vld [vmem:[#allocation5 + $0xb8] sm:$0xff]  ;;  %v639_v21 = vld [vmem:[#allocation5 + $0xb0] sm:$0xff] }
   0xd   :  { %679 = vset.pattern.permute.xlu2 %v780_v2  ;;  %361 = vperm.xlu1 %677, %v44_v3   ;;  %v785_v8 = vmov 14   ;;  %v786_v9 = vmov 18   ;;  %v787_v10 = vmov 19   ;;  %v788_v11 = vmov 6   ;;  %v638_v23 = vld [vmem:[#allocation5 + $0xa8] sm:$0xff]  ;;  %v648_v24 = vld [vmem:[#allocation5 + $0xf8] sm:$0xff] }
   0xe   :  { %255 = vperm.xlu0 %675, %v44_v3   ;;  %264 = vperm.xlu2 %679, %v44_v3   ;;  %v789_v12 = vmov 0   ;;  %v790_v14 = vmov 1   ;;  %v791_v15 = vmov 4   ;;  %v792_v16 = vmov 5   ;;  %v637_v25 = vld [vmem:[#allocation5 + $0xa0] sm:$0xff]  ;;  %v647_v26 = vld [vmem:[#allocation5 + $0xf0] sm:$0xff] }
   0xf   :  { %346 = vmatpush.bf16.msra.mxu2 %v640_v13  ;;  %v793_v17 = vmov 2   ;;  %v794_v18 = vmov 7   ;;  %v795_v19 = vmov 3   ;;  %v796_v20 = vmov 8   ;;  %452 = vmatpush.bf16.msra.mxu3 %v648_v24  ;;  %v636_v27 = vld [vmem:[#allocation5 + $0x98] sm:$0xff]  ;;  %v646_v28 = vld [vmem:[#allocation5 + $0xe8] sm:$0xff] }
  0x10   :  { %v797_v22 = vmov 9   ;;  %v635_v29 = vld [vmem:[#allocation5 + $0x90] sm:$0xff]  ;;  %v645_v30 = vld [vmem:[#allocation5 + $0xe0] sm:$0xff]  ;;  %v634_v31 = vld [vmem:[#allocation5 + $0x88] sm:$0xff]  ;;  %v821_v50 = vand.u32 127, %v42_v44  ;;  %v798_v59 = vmov 0.0  }
  0x11   :  { %v644_v32 = vld [vmem:[#allocation5 + $0xd8] sm:$0xff]  ;;  %v633_v33 = vld [vmem:[#allocation5 + $0x80] sm:$0xff]  ;;  %v643_v34 = vld [vmem:[#allocation5 + $0xd0] sm:$0xff]  ;;  %s799_s0 = smov [#allocation7]   ;;  %s474_s23 = sshll.u32 %s848_s2, 4  ;;  %s475_s23 = int_to_ptr.hbm [resolvable:$true] %s474_s23 }
  0x12   :  { %v642_v35 = vld [vmem:[#allocation5 + $0xc8] sm:$0xff]  ;;  %v624_v36 = vld [vmem:[#allocation5 + $0x38] sm:$0xff]  ;;  %v641_v37 = vld [vmem:[#allocation5 + $0xc0] sm:$0xff]  ;;  %s472_s1 = sshll.u32 %s799_s0, 4  ;;  %s473_s1 = int_to_ptr.vmem [resolvable:$true] %s472_s1 }
  0x13   :  { %347 = vmatpush.bf16.msra.mxu2 %v639_v21  ;;  %453 = vmatpush.bf16.msra.mxu3 %v647_v26  ;;  %v623_v41 = vld [vmem:[#allocation5 + $0x30] sm:$0xff]  ;;  %v632_v42 = vld [vmem:[#allocation5 + $0x78] sm:$0xff]  ;;  %v622_v43 = vld [vmem:[#allocation5 + $0x28] sm:$0xff] }
  0x14   :  { %241 = vmatpush.bf16.msra.mxu1 %v624_v36  ;;  %180 = vmatpush.bf16.msra.mxu0 %v632_v42  ;;  %v631_v45 = vld [vmem:[#allocation5 + $0x70] sm:$0xff]  ;;  %v621_v46 = vld [vmem:[#allocation5 + $0x20] sm:$0xff]  ;;  %v630_v51 = vld [vmem:[#allocation5 + $0x68] sm:$0xff] }
  0x15   :  { %678 = vset.pattern.permute.xlu1 %v781_v4  ;;  %v620_v52 = vld [vmem:[#allocation5 + $0x18] sm:$0xff]  ;;  %v629_v53 = vld [vmem:[#allocation5 + $0x60] sm:$0xff]  ;;  %v619_v54 = vld [vmem:[#allocation5 + $0x10] sm:$0xff] }
  0x16   :  { %676 = vset.pattern.permute.xlu0 %v782_v5  ;;  %365 = vperm.xlu1 %678, %v44_v3   ;;  %v628_v58 = vld [vmem:[#allocation5 + $0x58] sm:$0xff]  ;;  %v618_v61 = vld [vmem:[#allocation5 + $0x8] sm:$0xff]  ;;  %v627_v63 = vld [vmem:[#allocation5 + $0x50] sm:$0xff] }
  0x17   :  { %259 = vperm.xlu0 %676, %v44_v3   ;;  %680 = vset.pattern.permute.xlu2 %v783_v6  ;;  %v617_v0 = vld [vmem:[#allocation5] sm:$0xff] }
  0x18   :  { %370 = vperm.xlu2 %680, %v44_v3   ;;  %348 = vmatpush.bf16.msra.mxu2 %v638_v23  ;;  %v625_v6 = vld [vmem:[#allocation5 + $0x40] sm:$0xff] }
  0x19   :  { %454 = vmatpush.bf16.msra.mxu3 %v646_v28  ;;  %242 = vmatpush.bf16.msra.mxu1 %v623_v41 }
  0x1a   :  { %181 = vmatpush.bf16.msra.mxu0 %v631_v45 }
  0x1c   :  { %349 = vmatpush.bf16.msra.mxu2 %v637_v25 }
  0x1d   :  { %455 = vmatpush.bf16.msra.mxu3 %v645_v30  ;;  %243 = vmatpush.bf16.msra.mxu1 %v622_v43 }
  0x1e   :  { %681 = vset.pattern.permute.xlu1 %v784_v7  ;;  %182 = vmatpush.bf16.msra.mxu0 %v630_v51 }
  0x1f   :  { %683 = vset.pattern.permute.xlu0 %v785_v8  ;;  %269 = vperm.xlu1 %681, %v44_v3  }
  0x20   :  { %274 = vperm.xlu0 %683, %v44_v3   ;;  %682 = vset.pattern.permute.xlu2 %v786_v9 }
  0x21   :  { %375 = vperm.xlu2 %682, %v44_v3   ;;  %350 = vmatpush.bf16.msra.mxu2 %v636_v27 }
  0x22   :  { %456 = vmatpush.bf16.msra.mxu3 %v644_v32  ;;  %244 = vmatpush.bf16.msra.mxu1 %v621_v46 }
  0x23   :  { %183 = vmatpush.bf16.msra.mxu0 %v629_v53 }
  0x25   :  { %351 = vmatpush.bf16.msra.mxu2 %v635_v29 }
  0x26   :  { %457 = vmatpush.bf16.msra.mxu3 %v643_v34  ;;  %245 = vmatpush.bf16.msra.mxu1 %v620_v52 }
  0x27   :  { %684 = vset.pattern.permute.xlu1 %v787_v10  ;;  %184 = vmatpush.bf16.msra.mxu0 %v628_v58 }
  0x28   :  { %688 = vset.pattern.permute.xlu0 %v788_v11  ;;  %380 = vperm.xlu1 %684, %v44_v3  }
  0x29   :  { %93 = vperm.xlu0 %688, %v44_v3   ;;  %685 = vset.pattern.permute.xlu2 %v789_v12 }
  0x2a   :  { %46 = vperm.xlu2 %685, %v44_v3   ;;  %352 = vmatpush.bf16.msra.mxu2 %v634_v31 }
  0x2b   :  { %458 = vmatpush.bf16.msra.mxu3 %v642_v35  ;;  %246 = vmatpush.bf16.msra.mxu1 %v619_v54 }
  0x2c   :  { %185 = vmatpush.bf16.msra.mxu0 %v627_v63 }
  0x2e   :  { %353 = vmatpush.bf16.msra.mxu2 %v633_v33 }
  0x2f   :  { %459 = vmatpush.bf16.msra.mxu3 %v641_v37  ;;  %247 = vmatpush.bf16.msra.mxu1 %v618_v61 }
  0x30   :  { %686 = vset.pattern.permute.xlu1 %v790_v14 }
  0x31   :  { %693 = vset.pattern.permute.xlu0 %v791_v15  ;;  %50 = vperm.xlu1 %686, %v44_v3  }
  0x32   :  { %65 = vperm.xlu0 %693, %v44_v3   ;;  %687 = vset.pattern.permute.xlu2 %v792_v16 }
  0x33   :  { %89 = vperm.xlu2 %687, %v44_v3   ;;  %248 = vmatpush.bf16.msra.mxu1 %v617_v0 }
  0x39   :  { %689 = vset.pattern.permute.xlu1 %v793_v17 }
  0x3a   :  { %695 = vset.pattern.permute.xlu0 %v787_v10  ;;  %55 = vperm.xlu1 %689, %v44_v3  }
  0x3b   :  { %690 = vset.pattern.permute.xlu2 %v794_v18 }
  0x3c   :  { %98 = vperm.xlu2 %690, %v44_v3  }
  0x42   :  { %691 = vset.pattern.permute.xlu1 %v795_v19 }
  0x43   :  { %60 = vperm.xlu1 %691, %v44_v3  }
  0x44   :  { %692 = vset.pattern.permute.xlu2 %v796_v20 }
  0x45   :  { %103 = vperm.xlu2 %692, %v44_v3  }
  0x4b   :  { %694 = vset.pattern.permute.xlu1 %v797_v22 }
  0x4c   :  { %108 = vperm.xlu1 %694, %v44_v3   ;;  %v626_v3 = vld [vmem:[#allocation5 + $0x48] sm:$0xff] }
  0x4d   :  { %186 = vmatpush.bf16.msra.mxu0 %v626_v3 }
  0x51   :  { %187 = vmatpush.bf16.msra.mxu0 %v625_v6 }
  0x68   :  { %v265_v38 = vpop.permute.xlu2 %264 }
  0x69   :  { %vm266_vm3 = vcmp.eq.s32.totalorder %v821_v50, %v265_v38 }
  0x72   :  { %v371_v48 = vpop.permute.xlu2 %370 }
  0x73   :  { %vm372_vm11 = vcmp.eq.s32.totalorder %v821_v50, %v371_v48 }
  0x7b   :  { %v376_v57 = vpop.permute.xlu2 %375 }
  0x7c   :  { %vm377_vm14 = vcmp.eq.s32.totalorder %v821_v50, %v376_v57 }
  0x7f   :  { %v362_v39 = vpop.permute.xlu1 %361 }
  0x80   :  { %v256_v40 = vpop.permute.xlu0 %255  ;;  %vm363_vm9 = vcmp.eq.s32.totalorder %v821_v50, %v362_v39 }
  0x81   :  { %vm257_vm0 = vcmp.eq.s32.totalorder %v821_v50, %v256_v40 }
  0x84   :  { %v47_v2 = vpop.permute.xlu2 %46 }
  0x88   :  { %v366_v47 = vpop.permute.xlu1 %365 }
  0x89   :  { %v260_v49 = vpop.permute.xlu0 %259  ;;  %vm367_vm4 = vcmp.eq.s32.totalorder %v821_v50, %v366_v47 }
  0x8a   :  { %vm261_vm1 = vcmp.eq.s32.totalorder %v821_v50, %v260_v49  ;;  %vm368_vm12 = vmor %vm363_vm9, %vm367_vm4 }
  0x8b   :  { %vm262_vm2 = vmor %vm257_vm0, %vm261_vm1 }
  0x8c   :  { %vm267_vm5 = vmor %vm262_vm2, %vm266_vm3  ;;  %vm48_vm2 = vcmp.eq.s32.totalorder %v821_v50, %v47_v2 }
  0x8d   :  { %vm373_vm13 = vmor %vm368_vm12, %vm372_vm11  ;;  %v90_v8 = vpop.permute.xlu2 %89 }
  0x8e   :  { %vm378_vm15 = vmor %vm373_vm13, %vm377_vm14 }
  0x91   :  { %v270_v55 = vpop.permute.xlu1 %269 }
  0x92   :  { %v275_v56 = vpop.permute.xlu0 %274  ;;  %vm271_vm6 = vcmp.eq.s32.totalorder %v821_v50, %v270_v55 }
  0x93   :  { %vm276_vm7 = vcmp.eq.s32.totalorder %v821_v50, %v275_v56  ;;  %vm272_vm8 = vmor %vm267_vm5, %vm271_vm6 }
  0x94   :  { %vm277_vm10 = vmor %vm272_vm8, %vm276_vm7  ;;  %vm91_vm7 = vcmp.eq.s32.totalorder %v821_v50, %v90_v8 }
  0x95   :  { %v551_v60 = vsel %vm277_vm10, 1.0, %v798_v59 }
  0x96   :  { %v280_v62 = vpack.c.bf16 %v551_v60, %v551_v60  ;;  %v99_v11 = vpop.permute.xlu2 %98 }
  0x97   :  { %vm100_vm13 = vcmp.eq.s32.totalorder %v821_v50, %v99_v11 }
  0x98   :  { %354 = vmatmul.bf16.vlgmr.msra.gmra.mxu2 %v280_v62 }
  0x9a   :  { %v381_v1 = vpop.permute.xlu1 %380 }
  0x9b   :  { %vm382_vm0 = vcmp.eq.s32.totalorder %v821_v50, %v381_v1  ;;  %v94_v9 = vpop.permute.xlu0 %93 }
  0x9c   :  { %vm383_vm1 = vmor %vm378_vm15, %vm382_vm0  ;;  %vm95_vm8 = vcmp.eq.s32.totalorder %v821_v50, %v94_v9 }
  0x9d   :  { %v584_v4 = vsel %vm383_vm1, 1.0, %v798_v59  ;;  %vm96_vm14 = vmor %vm91_vm7, %vm95_vm8 }
  0x9e   :  { %v386_v5 = vpack.c.bf16 %v584_v4, %v584_v4  ;;  %vm101_vm15 = vmor %vm96_vm14, %vm100_vm13 }
  0x9f   :  { %v104_v14 = vpop.permute.xlu2 %103 }
  0xa0   :  { %460 = vmatmul.bf16.vlgmr.msra.gmra.mxu3 %v386_v5  ;;  %vm105_vm0 = vcmp.eq.s32.totalorder %v821_v50, %v104_v14 }
  0xa1   :  { %vm106_vm1 = vmor %vm101_vm15, %vm105_vm0 }
  0xa3   :  { %v51_v7 = vpop.permute.xlu1 %50 }
  0xa4   :  { %vm52_vm3 = vcmp.eq.s32.totalorder %v821_v50, %v51_v7  ;;  %v66_v12 = vpop.permute.xlu0 %65 }
  0xa5   :  { %vm53_vm5 = vmor %vm48_vm2, %vm52_vm3  ;;  %vm67_vm6 = vcmp.eq.s32.totalorder %v821_v50, %v66_v12 }
  0xac   :  { %v56_v10 = vpop.permute.xlu1 %55 }
  0xad   :  { %vm57_vm4 = vcmp.eq.s32.totalorder %v821_v50, %v56_v10 }
  0xae   :  { %vm58_vm9 = vmor %vm53_vm5, %vm57_vm4 }
  0xb5   :  { %v61_v13 = vpop.permute.xlu1 %60 }
  0xb6   :  { %vm62_vm10 = vcmp.eq.s32.totalorder %v821_v50, %v61_v13 }
  0xb7   :  { %vm63_vm11 = vmor %vm58_vm9, %vm62_vm10 }
  0xb8   :  { %vm68_vm12 = vmor %vm63_vm11, %vm67_vm6 }
  0xb9   :  { %v485_v15 = vsel %vm68_vm12, 1.0, %v798_v59 }
  0xba   :  { %v71_v16 = vpack.c.bf16 %v485_v15, %v485_v15 }
  0xbc   :  { %249 = vmatmul.bf16.vlgmr.msra.gmra.mxu1 %v71_v16 }
  0xbe   :  { %v109_v17 = vpop.permute.xlu1 %108 }
  0xbf   :  { %vm110_vm2 = vcmp.eq.s32.totalorder %v821_v50, %v109_v17 }
  0xc0   :  { %vm111_vm3 = vmor %vm106_vm1, %vm110_vm2 }
  0xc1   :  { %v486_v18 = vsel %vm111_vm3, 1.0, %v798_v59 }
  0xc2   :  { %v114_v19 = vpack.c.bf16 %v486_v18, %v486_v18 }
  0xc4   :  { %188 = vmatmul.bf16.vlgmr.msra.gmra.mxu0 %v114_v19 }
 0x11b   :  { %v355_v20 = vpop.f32.mrf.mxu2 }
 0x123   :  { %v357_v21 = vpop.f32.mrf.mxu2  ;;  %v461_v22 = vpop.f32.mrf.mxu3 }
 0x12b   :  { %v463_v23 = vpop.f32.mrf.mxu3 }
 0x139   :  { %v250_v24 = vpop.f32.mrf.mxu1 }
 0x141   :  { %v189_v25 = vpop.f32.mrf.mxu0  ;;  %v252_v26 = vpop.f32.mrf.mxu1 }
 0x142   :  { %v251_v27 = vadd.f32 %v250_v24, %v189_v25 }
 0x144   :  { %v359_v28 = vadd.f32 %v355_v20, %v251_v27 }
 0x146   :  { %v465_v29 = vadd.f32 %v461_v22, %v359_v28 }
 0x148   :  { %466 = vst [vmem:[#allocation7] sm:$0xff] %v465_v29 }
 0x149   :  { %v191_v30 = vpop.f32.mrf.mxu0  ;;  %477 = dma.vmem_to_hbm [thread:$0]  %s473_s1, 128, %s475_s23, [#allocation4]  }
 0x14a   :  { %772 = dma.done.wait [#allocation4], 128  }
 0x14b   :  { %773 = vsyncadd [#allocation4], 4294967168 }
 0x14c   :  { %482 = vsyncpa [#allocation3], 1 }
 0x14d   :  { %483 = vsyncpa [#allocation6], 1 }
 0x14e   :  { %484 = vsyncpa [#allocation4], 1 }

</bundles_post_ra>
